<compile_context>
chip_gen: v5e
topology: v5e:2x2
jax: 0.10.0
libtpu: 0.0.40
codegen_flags: <defaults>
</compile_context>

<pallas_src>
import functools

import jax
import jax.numpy as jnp
from jax.experimental import pallas as pl
from jax.experimental.pallas import tpu as pltpu


def mha_kernel(q_ref, k_ref, v_ref, mask_ref,
               wq_ref, bq_ref, wk_ref, bk_ref,
               wv_ref, bv_ref, wo_ref, bo_ref,
               x_out_ref, attn_out_ref,
               ctx_ref,
               *, n_heads, head_dim):
    # Compute dtype for MXU operands: keep the input dtype (bf16 stays bf16,
    # f32 stays f32); accumulation is always f32 via preferred_element_type.
    cdt = q_ref.dtype

    q = q_ref[0]        # (block_q, H)
    k = k_ref[0]        # (Lk, H)
    v = v_ref[0]        # (Lk, H)

    # Linear projections (MXU matmuls, f32 accumulate).
    Q = jnp.dot(q, wq_ref[...], preferred_element_type=jnp.float32) + bq_ref[0]
    K = jnp.dot(k, wk_ref[...], preferred_element_type=jnp.float32) + bk_ref[0]
    V = jnp.dot(v, wv_ref[...], preferred_element_type=jnp.float32) + bv_ref[0]

    # Fold the 1/sqrt(head_dim) scale into Q once (cheap, O(block_q * H)).
    inv_scale = jnp.float32(1.0 / (float(head_dim) ** 0.5))
    Q = Q * inv_scale

    # Cast MXU operands back to the input dtype (no-op for f32 inputs).
    Qc = Q.astype(cdt)
    Kc = K.astype(cdt)
    Vc = V.astype(cdt)

    # Additive mask bias, computed once per (q-tile, k) and reused across heads.
    # Large finite negative instead of -inf: masked logits underflow to exactly
    # 0 after exp, and fully-masked rows stay NaN-free.
    mask = mask_ref[0]  # (block_q, Lk)
    bias = jnp.where(mask == 0, jnp.float32(-1e30), jnp.float32(0.0))

    # Per-head attention via static lane slices of the hidden dim — no
    # reshape/transpose head split, no (h, L, d) minor-dim layouts.
    for h in range(n_heads):
        lo = h * head_dim
        hi = lo + head_dim
        Qh = Qc[:, lo:hi]        # (block_q, d)
        Kh = Kc[:, lo:hi]        # (Lk, d)
        Vh = Vc[:, lo:hi]        # (Lk, d)

        # scores = Qh @ Kh^T, contraction on the last dim of both operands
        # (no explicit transpose of Kh).
        s = jax.lax.dot_general(
            Qh, Kh, (((1,), (1,)), ((), ())),
            preferred_element_type=jnp.float32)      # (block_q, Lk) f32
        s = s + bias

        # Numerically stable softmax; reciprocal goes to the EUP slot.
        m = jnp.max(s, axis=-1, keepdims=True)
        e = jnp.exp(s - m)
        denom = jnp.sum(e, axis=-1, keepdims=True)
        p = e * pl.reciprocal(denom, approx=True)    # (block_q, Lk)

        # TODO(synk): dropout on the attention weights is omitted
        # (eval-mode / p=0).

        # Context for this head; merged via a static lane slice of the
        # (block_q, H) VMEM scratch (no head-merge transpose).
        ctx_h = jnp.dot(p.astype(cdt), Vh,
                        preferred_element_type=jnp.float32)   # (block_q, d)
        ctx_ref[:, lo:hi] = ctx_h

        # Attention weights output (in the input dtype to halve HBM traffic
        # for bf16 models).
        attn_out_ref[0, h] = p.astype(attn_out_ref.dtype)

    # Output projection of the merged context.
    out = jnp.dot(ctx_ref[...].astype(cdt), wo_ref[...],
                  preferred_element_type=jnp.float32) + bo_ref[0]
    x_out_ref[0] = out.astype(x_out_ref.dtype)


def _pick_block_q(lq):
    """Largest q tile that satisfies the (8,128) block constraint."""
    if lq <= 128:
        return lq
    for cand in (128, 64, 32, 16, 8):
        if lq % cand == 0:
            return cand
    return lq


def multi_head_attention(query, key, value, mask, params, n_heads, *,
                         block_q=None):
    """params = (wq, bq, wk, bk, wv, bv, wo, bo); w* are (H, H) = torch_W.T,
    b* are (1, H).  Returns (x, attention) like the PyTorch module."""
    B, Lq, H = query.shape
    Lk = key.shape[1]
    assert H % n_heads == 0
    head_dim = H // n_heads
    wq, bq, wk, bk, wv, bv, wo, bo = params

    if mask is None:
        mask = jnp.ones((B, Lq, Lk), dtype=query.dtype)

    if block_q is None:
        block_q = _pick_block_q(Lq)
    assert Lq % block_q == 0, "Lq must be divisible by block_q"
    assert block_q == Lq or block_q % 8 == 0, "block_q must be a multiple of 8"
    nq = Lq // block_q

    kernel = functools.partial(mha_kernel, n_heads=n_heads, head_dim=head_dim)

    q_spec = pl.BlockSpec((1, block_q, H), lambda b, qi: (b, qi, 0))
    kv_spec = pl.BlockSpec((1, Lk, H), lambda b, qi: (b, 0, 0))
    mask_spec = pl.BlockSpec((1, block_q, Lk), lambda b, qi: (b, qi, 0))
    # Weights/biases have constant index maps, so the pipeline DMAs them only
    # once; (where supported, pipeline_mode=pl.Buffered(1) would additionally
    # drop their second revolving buffer to free VMEM on v7x).
    w_spec = pl.BlockSpec((H, H), lambda b, qi: (0, 0))
    b_spec = pl.BlockSpec((1, H), lambda b, qi: (0, 0))

    out_shapes = (
        jax.ShapeDtypeStruct((B, Lq, H), query.dtype),
        jax.ShapeDtypeStruct((B, n_heads, Lq, Lk), query.dtype),
    )
    out_specs = (
        pl.BlockSpec((1, block_q, H), lambda b, qi: (b, qi, 0)),
        pl.BlockSpec((1, n_heads, block_q, Lk), lambda b, qi: (b, 0, qi, 0)),
    )

    return pl.pallas_call(
        kernel,
        out_shape=out_shapes,
        grid_spec=pltpu.PrefetchScalarGridSpec(
            num_scalar_prefetch=0,
            grid=(B, nq),
            in_specs=[q_spec, kv_spec, kv_spec, mask_spec,
                      w_spec, b_spec, w_spec, b_spec,
                      w_spec, b_spec, w_spec, b_spec],
            out_specs=out_specs,
            scratch_shapes=[pltpu.VMEM((block_q, H), jnp.float32)],
        ),
        compiler_params=pltpu.CompilerParams(
            dimension_semantics=("parallel", "parallel"),
            vmem_limit_bytes=32 * 1024 * 1024,
        ),
    )(query, key, value, mask, wq, bq, wk, bk, wv, bv, wo, bo)


def reference_mha(query, key, value, mask, params, n_heads):
    """Pure-JAX reference mirroring the PyTorch forward."""
    wq, bq, wk, bk, wv, bv, wo, bo = params
    B, Lq, H = query.shape
    Lk = key.shape[1]
    d = H // n_heads
    Q = query @ wq + bq[0]
    K = key @ wk + bk[0]
    V = value @ wv + bv[0]
    Qh = Q.reshape(B, Lq, n_heads, d).transpose(0, 2, 1, 3)
    Kh = K.reshape(B, Lk, n_heads, d).transpose(0, 2, 1, 3)
    Vh = V.reshape(B, Lk, n_heads, d).transpose(0, 2, 1, 3)
    scores = jnp.einsum('bhqd,bhkd->bhqk', Qh, Kh) / jnp.sqrt(jnp.float32(d))
    scores = jnp.where(mask[:, None, :, :] == 0, -jnp.inf, scores)
    attn = jax.nn.softmax(scores, axis=-1)
    ctx = jnp.einsum('bhqk,bhkd->bhqd', attn, Vh)
    ctx = ctx.transpose(0, 2, 1, 3).reshape(B, Lq, H)
    x = ctx @ wo + bo[0]
    return x, attn


if __name__ == "__main__":
    B, L, H, n_heads = 2, 16, 32, 4

    key0 = jax.random.PRNGKey(0)
    ks = jax.random.split(key0, 12)

    query = jax.random.normal(ks[0], (B, L, H), dtype=jnp.float32)
    key_in = jax.random.normal(ks[1], (B, L, H), dtype=jnp.float32)
    value = jax.random.normal(ks[2], (B, L, H), dtype=jnp.float32)
    # Causal mask (some masked positions, no fully-masked rows).
    causal = (jnp.arange(L)[:, None] >= jnp.arange(L)[None, :]).astype(jnp.float32)
    mask = jnp.broadcast_to(causal[None], (B, L, L))

    def init_linear(kw, kb):
        # Deterministic init; stored as (in, out) = torch_W.T, bias as (1, out).
        w = jax.random.normal(kw, (H, H), dtype=jnp.float32) * 0.05
        b = jax.random.normal(kb, (1, H), dtype=jnp.float32) * 0.01
        return w, b

    wq, bq = init_linear(ks[3], ks[4])
    wk, bk = init_linear(ks[5], ks[6])
    wv, bv = init_linear(ks[7], ks[8])
    wo, bo = init_linear(ks[9], ks[10])
    params = (wq, bq, wk, bk, wv, bv, wo, bo)

    # block_q=8 exercises the (batch, q_block) grid even at this small size.
    x_out, attn_out = multi_head_attention(query, key_in, value, mask,
                                           params, n_heads, block_q=8)
    jax.block_until_ready((x_out, attn_out))

    x_ref, attn_ref = reference_mha(query, key_in, value, mask, params, n_heads)
    assert x_out.shape == (B, L, H)
    assert attn_out.shape == (B, n_heads, L, L)
    # Tolerance accounts for the approximate (EUP) reciprocal in the softmax
    # denominator (~2^-12 relative error).
    assert jnp.allclose(x_out, x_ref, atol=2e-3, rtol=2e-3)
    assert jnp.allclose(attn_out, attn_ref.astype(attn_out.dtype),
                        atol=2e-3, rtol=2e-3)

    print("KERNEL_OK")
</pallas_src>

<mosaic_0001>
module attributes {stable_mosaic.version = 11 : i64} {
  func.func @mha_kernel(%arg0: i32, %arg1: i32, %arg2: memref<1x8x32xf32, #tpu.memory_space<vmem>>, %arg3: memref<1x16x32xf32, #tpu.memory_space<vmem>>, %arg4: memref<1x16x32xf32, #tpu.memory_space<vmem>>, %arg5: memref<1x8x16xf32, #tpu.memory_space<vmem>>, %arg6: memref<32x32xf32, #tpu.memory_space<vmem>>, %arg7: memref<1x32xf32, #tpu.memory_space<vmem>>, %arg8: memref<32x32xf32, #tpu.memory_space<vmem>>, %arg9: memref<1x32xf32, #tpu.memory_space<vmem>>, %arg10: memref<32x32xf32, #tpu.memory_space<vmem>>, %arg11: memref<1x32xf32, #tpu.memory_space<vmem>>, %arg12: memref<32x32xf32, #tpu.memory_space<vmem>>, %arg13: memref<1x32xf32, #tpu.memory_space<vmem>>, %arg14: memref<1x8x32xf32, #tpu.memory_space<vmem>>, %arg15: memref<1x4x8x16xf32, #tpu.memory_space<vmem>>, %arg16: memref<8x32xf32, #tpu.memory_space<vmem>>) attributes {dimension_semantics = [#tpu.dimension_semantics<parallel>, #tpu.dimension_semantics<parallel>], iteration_bounds = array<i64: 2, 2>, scalar_prefetch = 0 : i64, scratch_operands = 1 : i64, tpu.core_type = #tpu.core_type<tc>, window_params = [{transform_indices = @transform_0, window_bounds = array<i64: 1, 8, 32>}, {transform_indices = @transform_1, window_bounds = array<i64: 1, 16, 32>}, {transform_indices = @transform_2, window_bounds = array<i64: 1, 16, 32>}, {transform_indices = @transform_3, window_bounds = array<i64: 1, 8, 16>}, {pipeline_mode = #tpu.pipeline_mode<synchronous>, transform_indices = @transform_4, window_bounds = array<i64: 32, 32>}, {pipeline_mode = #tpu.pipeline_mode<synchronous>, transform_indices = @transform_5, window_bounds = array<i64: 1, 32>}, {pipeline_mode = #tpu.pipeline_mode<synchronous>, transform_indices = @transform_6, window_bounds = array<i64: 32, 32>}, {pipeline_mode = #tpu.pipeline_mode<synchronous>, transform_indices = @transform_7, window_bounds = array<i64: 1, 32>}, {pipeline_mode = #tpu.pipeline_mode<synchronous>, transform_indices = @transform_8, window_bounds = array<i64: 32, 32>}, {pipeline_mode = #tpu.pipeline_mode<synchronous>, transform_indices = @transform_9, window_bounds = array<i64: 1, 32>}, {pipeline_mode = #tpu.pipeline_mode<synchronous>, transform_indices = @transform_10, window_bounds = array<i64: 32, 32>}, {pipeline_mode = #tpu.pipeline_mode<synchronous>, transform_indices = @transform_11, window_bounds = array<i64: 1, 32>}, {transform_indices = @transform_12, window_bounds = array<i64: 1, 8, 32>}, {transform_indices = @transform_13, window_bounds = array<i64: 1, 4, 8, 16>}]} {
    %c0 = arith.constant 0 : index
    %c0_0 = arith.constant 0 : index
    %c0_1 = arith.constant 0 : index
    %0 = vector.load %arg2[%c0, %c0_0, %c0_1] : memref<1x8x32xf32, #tpu.memory_space<vmem>>, vector<1x8x32xf32>
    %1 = vector.shape_cast %0 : vector<1x8x32xf32> to vector<8x32xf32>
    %c0_2 = arith.constant 0 : index
    %c0_3 = arith.constant 0 : index
    %c0_4 = arith.constant 0 : index
    %2 = vector.load %arg3[%c0_2, %c0_3, %c0_4] : memref<1x16x32xf32, #tpu.memory_space<vmem>>, vector<1x16x32xf32>
    %3 = vector.shape_cast %2 : vector<1x16x32xf32> to vector<16x32xf32>
    %c0_5 = arith.constant 0 : index
    %c0_6 = arith.constant 0 : index
    %c0_7 = arith.constant 0 : index
    %4 = vector.load %arg4[%c0_5, %c0_6, %c0_7] : memref<1x16x32xf32, #tpu.memory_space<vmem>>, vector<1x16x32xf32>
    %5 = vector.shape_cast %4 : vector<1x16x32xf32> to vector<16x32xf32>
    %c0_8 = arith.constant 0 : index
    %c0_9 = arith.constant 0 : index
    %6 = vector.load %arg6[%c0_8, %c0_9] : memref<32x32xf32, #tpu.memory_space<vmem>>, vector<32x32xf32>
    %cst = arith.constant dense<0.000000e+00> : vector<8x32xf32>
    %7 = tpu.matmul %1, %6, %cst {dimension_numbers = #tpu.dot_dimension_numbers<[1], [0], [0], [1], [0, 0, 1, 1], [], []>} : vector<8x32xf32>, vector<32x32xf32>, vector<8x32xf32> -> vector<8x32xf32>
    %c0_10 = arith.constant 0 : index
    %c0_11 = arith.constant 0 : index
    %8 = vector.load %arg7[%c0_10, %c0_11] : memref<1x32xf32, #tpu.memory_space<vmem>>, vector<1x32xf32>
    %9 = vector.shape_cast %8 : vector<1x32xf32> to vector<32xf32>
    %10 = vector.shape_cast %9 : vector<32xf32> to vector<1x32xf32>
    %11 = vector.broadcast %10 : vector<1x32xf32> to vector<8x32xf32>
    %12 = arith.addf %7, %11 : vector<8x32xf32>
    %c0_12 = arith.constant 0 : index
    %c0_13 = arith.constant 0 : index
    %13 = vector.load %arg8[%c0_12, %c0_13] : memref<32x32xf32, #tpu.memory_space<vmem>>, vector<32x32xf32>
    %cst_14 = arith.constant dense<0.000000e+00> : vector<16x32xf32>
    %14 = tpu.matmul %3, %13, %cst_14 {dimension_numbers = #tpu.dot_dimension_numbers<[1], [0], [0], [1], [0, 0, 1, 1], [], []>} : vector<16x32xf32>, vector<32x32xf32>, vector<16x32xf32> -> vector<16x32xf32>
    %c0_15 = arith.constant 0 : index
    %c0_16 = arith.constant 0 : index
    %15 = vector.load %arg9[%c0_15, %c0_16] : memref<1x32xf32, #tpu.memory_space<vmem>>, vector<1x32xf32>
    %16 = vector.shape_cast %15 : vector<1x32xf32> to vector<32xf32>
    %17 = vector.shape_cast %16 : vector<32xf32> to vector<1x32xf32>
    %18 = vector.broadcast %17 : vector<1x32xf32> to vector<16x32xf32>
    %19 = arith.addf %14, %18 : vector<16x32xf32>
    %c0_17 = arith.constant 0 : index
    %c0_18 = arith.constant 0 : index
    %20 = vector.load %arg10[%c0_17, %c0_18] : memref<32x32xf32, #tpu.memory_space<vmem>>, vector<32x32xf32>
    %cst_19 = arith.constant dense<0.000000e+00> : vector<16x32xf32>
    %21 = tpu.matmul %5, %20, %cst_19 {dimension_numbers = #tpu.dot_dimension_numbers<[1], [0], [0], [1], [0, 0, 1, 1], [], []>} : vector<16x32xf32>, vector<32x32xf32>, vector<16x32xf32> -> vector<16x32xf32>
    %c0_20 = arith.constant 0 : index
    %c0_21 = arith.constant 0 : index
    %22 = vector.load %arg11[%c0_20, %c0_21] : memref<1x32xf32, #tpu.memory_space<vmem>>, vector<1x32xf32>
    %23 = vector.shape_cast %22 : vector<1x32xf32> to vector<32xf32>
    %24 = vector.shape_cast %23 : vector<32xf32> to vector<1x32xf32>
    %25 = vector.broadcast %24 : vector<1x32xf32> to vector<16x32xf32>
    %26 = arith.addf %21, %25 : vector<16x32xf32>
    %cst_22 = arith.constant 0.353553385 : f32
    %27 = vector.broadcast %cst_22 : f32 to vector<8x32xf32>
    %28 = arith.mulf %12, %27 : vector<8x32xf32>
    %c0_23 = arith.constant 0 : index
    %c0_24 = arith.constant 0 : index
    %c0_25 = arith.constant 0 : index
    %29 = vector.load %arg5[%c0_23, %c0_24, %c0_25] : memref<1x8x16xf32, #tpu.memory_space<vmem>>, vector<1x8x16xf32>
    %30 = vector.shape_cast %29 : vector<1x8x16xf32> to vector<8x16xf32>
    %cst_26 = arith.constant 0.000000e+00 : f32
    %31 = vector.broadcast %cst_26 : f32 to vector<8x16xf32>
    %32 = arith.cmpf oeq, %30, %31 : vector<8x16xf32>
    %cst_27 = arith.constant -1.000000e+30 : f32
    %cst_28 = arith.constant 0.000000e+00 : f32
    %33 = vector.broadcast %cst_27 : f32 to vector<8x16xf32>
    %34 = vector.broadcast %cst_28 : f32 to vector<8x16xf32>
    %35 = arith.select %32, %33, %34 : vector<8x16xi1>, vector<8x16xf32>
    %36 = vector.extract_strided_slice %28 {offsets = [0, 0], sizes = [8, 8], strides = [1, 1]} : vector<8x32xf32> to vector<8x8xf32>
    %37 = vector.extract_strided_slice %19 {offsets = [0, 0], sizes = [16, 8], strides = [1, 1]} : vector<16x32xf32> to vector<16x8xf32>
    %38 = vector.extract_strided_slice %26 {offsets = [0, 0], sizes = [16, 8], strides = [1, 1]} : vector<16x32xf32> to vector<16x8xf32>
    %cst_29 = arith.constant dense<0.000000e+00> : vector<8x16xf32>
    %39 = tpu.matmul %36, %37, %cst_29 {dimension_numbers = #tpu.dot_dimension_numbers<[1], [1], [0], [0], [0, 0, 1, 0], [], []>} : vector<8x8xf32>, vector<16x8xf32>, vector<8x16xf32> -> vector<8x16xf32>
    %40 = arith.addf %39, %35 : vector<8x16xf32>
    %cst_30 = arith.constant dense<0xFF800000> : vector<8xf32>
    %41 = vector.multi_reduction <maximumf>, %40, %cst_30 [1] : vector<8x16xf32> to vector<8xf32>
    %42 = vector.shape_cast %41 : vector<8xf32> to vector<8x1xf32>
    %43 = vector.broadcast %42 : vector<8x1xf32> to vector<8x16xf32>
    %44 = arith.subf %40, %43 : vector<8x16xf32>
    %45 = math.exp %44 : vector<8x16xf32>
    %cst_31 = arith.constant dense<0.000000e+00> : vector<8xf32>
    %46 = vector.multi_reduction <add>, %45, %cst_31 [1] : vector<8x16xf32> to vector<8xf32>
    %47 = vector.shape_cast %46 : vector<8xf32> to vector<8x1xf32>
    %48 = tpu.reciprocal %47 {approx = true} : vector<8x1xf32> -> vector<8x1xf32>
    %49 = vector.broadcast %48 : vector<8x1xf32> to vector<8x16xf32>
    %50 = arith.mulf %45, %49 : vector<8x16xf32>
    %cst_32 = arith.constant dense<0.000000e+00> : vector<8x8xf32>
    %51 = tpu.matmul %50, %38, %cst_32 {dimension_numbers = #tpu.dot_dimension_numbers<[1], [0], [0], [1], [0, 0, 1, 1], [], []>} : vector<8x16xf32>, vector<16x8xf32>, vector<8x8xf32> -> vector<8x8xf32>
    %c0_33 = arith.constant 0 : index
    %c0_34 = arith.constant 0 : index
    %52 = vector.load %arg16[%c0_33, %c0_34] : memref<8x32xf32, #tpu.memory_space<vmem>>, vector<8x8xf32>
    tpu.vector_store %arg16[%c0_33, %c0_34], %51 {strides = array<i32>} : memref<8x32xf32, #tpu.memory_space<vmem>>, vector<8x8xf32>,
    %c0_35 = arith.constant 0 : index
    %c0_36 = arith.constant 0 : index
    %c0_37 = arith.constant 0 : index
    %c0_38 = arith.constant 0 : index
    %53 = vector.load %arg15[%c0_35, %c0_36, %c0_37, %c0_38] : memref<1x4x8x16xf32, #tpu.memory_space<vmem>>, vector<1x1x8x16xf32>
    %54 = vector.shape_cast %53 : vector<1x1x8x16xf32> to vector<8x16xf32>
    %55 = vector.shape_cast %50 : vector<8x16xf32> to vector<1x1x8x16xf32>
    tpu.vector_store %arg15[%c0_35, %c0_36, %c0_37, %c0_38], %55 {strides = array<i32>} : memref<1x4x8x16xf32, #tpu.memory_space<vmem>>, vector<1x1x8x16xf32>,
    %56 = vector.extract_strided_slice %28 {offsets = [0, 8], sizes = [8, 8], strides = [1, 1]} : vector<8x32xf32> to vector<8x8xf32>
    %57 = vector.extract_strided_slice %19 {offsets = [0, 8], sizes = [16, 8], strides = [1, 1]} : vector<16x32xf32> to vector<16x8xf32>
    %58 = vector.extract_strided_slice %26 {offsets = [0, 8], sizes = [16, 8], strides = [1, 1]} : vector<16x32xf32> to vector<16x8xf32>
    %cst_39 = arith.constant dense<0.000000e+00> : vector<8x16xf32>
    %59 = tpu.matmul %56, %57, %cst_39 {dimension_numbers = #tpu.dot_dimension_numbers<[1], [1], [0], [0], [0, 0, 1, 0], [], []>} : vector<8x8xf32>, vector<16x8xf32>, vector<8x16xf32> -> vector<8x16xf32>
    %60 = arith.addf %59, %35 : vector<8x16xf32>
    %cst_40 = arith.constant dense<0xFF800000> : vector<8xf32>
    %61 = vector.multi_reduction <maximumf>, %60, %cst_40 [1] : vector<8x16xf32> to vector<8xf32>
    %62 = vector.shape_cast %61 : vector<8xf32> to vector<8x1xf32>
    %63 = vector.broadcast %62 : vector<8x1xf32> to vector<8x16xf32>
    %64 = arith.subf %60, %63 : vector<8x16xf32>
    %65 = math.exp %64 : vector<8x16xf32>
    %cst_41 = arith.constant dense<0.000000e+00> : vector<8xf32>
    %66 = vector.multi_reduction <add>, %65, %cst_41 [1] : vector<8x16xf32> to vector<8xf32>
    %67 = vector.shape_cast %66 : vector<8xf32> to vector<8x1xf32>
    %68 = tpu.reciprocal %67 {approx = true} : vector<8x1xf32> -> vector<8x1xf32>
    %69 = vector.broadcast %68 : vector<8x1xf32> to vector<8x16xf32>
    %70 = arith.mulf %65, %69 : vector<8x16xf32>
    %cst_42 = arith.constant dense<0.000000e+00> : vector<8x8xf32>
    %71 = tpu.matmul %70, %58, %cst_42 {dimension_numbers = #tpu.dot_dimension_numbers<[1], [0], [0], [1], [0, 0, 1, 1], [], []>} : vector<8x16xf32>, vector<16x8xf32>, vector<8x8xf32> -> vector<8x8xf32>
    %c0_43 = arith.constant 0 : index
    %c8 = arith.constant 8 : index
    %72 = vector.load %arg16[%c0_43, %c8] : memref<8x32xf32, #tpu.memory_space<vmem>>, vector<8x8xf32>
    tpu.vector_store %arg16[%c0_43, %c8], %71 {strides = array<i32>} : memref<8x32xf32, #tpu.memory_space<vmem>>, vector<8x8xf32>,
    %c0_44 = arith.constant 0 : index
    %c1 = arith.constant 1 : index
    %c0_45 = arith.constant 0 : index
    %c0_46 = arith.constant 0 : index
    %73 = vector.load %arg15[%c0_44, %c1, %c0_45, %c0_46] : memref<1x4x8x16xf32, #tpu.memory_space<vmem>>, vector<1x1x8x16xf32>
    %74 = vector.shape_cast %73 : vector<1x1x8x16xf32> to vector<8x16xf32>
    %75 = vector.shape_cast %70 : vector<8x16xf32> to vector<1x1x8x16xf32>
    tpu.vector_store %arg15[%c0_44, %c1, %c0_45, %c0_46], %75 {strides = array<i32>} : memref<1x4x8x16xf32, #tpu.memory_space<vmem>>, vector<1x1x8x16xf32>,
    %76 = vector.extract_strided_slice %28 {offsets = [0, 16], sizes = [8, 8], strides = [1, 1]} : vector<8x32xf32> to vector<8x8xf32>
    %77 = vector.extract_strided_slice %19 {offsets = [0, 16], sizes = [16, 8], strides = [1, 1]} : vector<16x32xf32> to vector<16x8xf32>
    %78 = vector.extract_strided_slice %26 {offsets = [0, 16], sizes = [16, 8], strides = [1, 1]} : vector<16x32xf32> to vector<16x8xf32>
    %cst_47 = arith.constant dense<0.000000e+00> : vector<8x16xf32>
    %79 = tpu.matmul %76, %77, %cst_47 {dimension_numbers = #tpu.dot_dimension_numbers<[1], [1], [0], [0], [0, 0, 1, 0], [], []>} : vector<8x8xf32>, vector<16x8xf32>, vector<8x16xf32> -> vector<8x16xf32>
    %80 = arith.addf %79, %35 : vector<8x16xf32>
    %cst_48 = arith.constant dense<0xFF800000> : vector<8xf32>
    %81 = vector.multi_reduction <maximumf>, %80, %cst_48 [1] : vector<8x16xf32> to vector<8xf32>
    %82 = vector.shape_cast %81 : vector<8xf32> to vector<8x1xf32>
    %83 = vector.broadcast %82 : vector<8x1xf32> to vector<8x16xf32>
    %84 = arith.subf %80, %83 : vector<8x16xf32>
    %85 = math.exp %84 : vector<8x16xf32>
    %cst_49 = arith.constant dense<0.000000e+00> : vector<8xf32>
    %86 = vector.multi_reduction <add>, %85, %cst_49 [1] : vector<8x16xf32> to vector<8xf32>
    %87 = vector.shape_cast %86 : vector<8xf32> to vector<8x1xf32>
    %88 = tpu.reciprocal %87 {approx = true} : vector<8x1xf32> -> vector<8x1xf32>
    %89 = vector.broadcast %88 : vector<8x1xf32> to vector<8x16xf32>
    %90 = arith.mulf %85, %89 : vector<8x16xf32>
    %cst_50 = arith.constant dense<0.000000e+00> : vector<8x8xf32>
    %91 = tpu.matmul %90, %78, %cst_50 {dimension_numbers = #tpu.dot_dimension_numbers<[1], [0], [0], [1], [0, 0, 1, 1], [], []>} : vector<8x16xf32>, vector<16x8xf32>, vector<8x8xf32> -> vector<8x8xf32>
    %c0_51 = arith.constant 0 : index
    %c16 = arith.constant 16 : index
    %92 = vector.load %arg16[%c0_51, %c16] : memref<8x32xf32, #tpu.memory_space<vmem>>, vector<8x8xf32>
    tpu.vector_store %arg16[%c0_51, %c16], %91 {strides = array<i32>} : memref<8x32xf32, #tpu.memory_space<vmem>>, vector<8x8xf32>,
    %c0_52 = arith.constant 0 : index
    %c2 = arith.constant 2 : index
    %c0_53 = arith.constant 0 : index
    %c0_54 = arith.constant 0 : index
    %93 = vector.load %arg15[%c0_52, %c2, %c0_53, %c0_54] : memref<1x4x8x16xf32, #tpu.memory_space<vmem>>, vector<1x1x8x16xf32>
    %94 = vector.shape_cast %93 : vector<1x1x8x16xf32> to vector<8x16xf32>
    %95 = vector.shape_cast %90 : vector<8x16xf32> to vector<1x1x8x16xf32>
    tpu.vector_store %arg15[%c0_52, %c2, %c0_53, %c0_54], %95 {strides = array<i32>} : memref<1x4x8x16xf32, #tpu.memory_space<vmem>>, vector<1x1x8x16xf32>,
    %96 = vector.extract_strided_slice %28 {offsets = [0, 24], sizes = [8, 8], strides = [1, 1]} : vector<8x32xf32> to vector<8x8xf32>
    %97 = vector.extract_strided_slice %19 {offsets = [0, 24], sizes = [16, 8], strides = [1, 1]} : vector<16x32xf32> to vector<16x8xf32>
    %98 = vector.extract_strided_slice %26 {offsets = [0, 24], sizes = [16, 8], strides = [1, 1]} : vector<16x32xf32> to vector<16x8xf32>
    %cst_55 = arith.constant dense<0.000000e+00> : vector<8x16xf32>
    %99 = tpu.matmul %96, %97, %cst_55 {dimension_numbers = #tpu.dot_dimension_numbers<[1], [1], [0], [0], [0, 0, 1, 0], [], []>} : vector<8x8xf32>, vector<16x8xf32>, vector<8x16xf32> -> vector<8x16xf32>
    %100 = arith.addf %99, %35 : vector<8x16xf32>
    %cst_56 = arith.constant dense<0xFF800000> : vector<8xf32>
    %101 = vector.multi_reduction <maximumf>, %100, %cst_56 [1] : vector<8x16xf32> to vector<8xf32>
    %102 = vector.shape_cast %101 : vector<8xf32> to vector<8x1xf32>
    %103 = vector.broadcast %102 : vector<8x1xf32> to vector<8x16xf32>
    %104 = arith.subf %100, %103 : vector<8x16xf32>
    %105 = math.exp %104 : vector<8x16xf32>
    %cst_57 = arith.constant dense<0.000000e+00> : vector<8xf32>
    %106 = vector.multi_reduction <add>, %105, %cst_57 [1] : vector<8x16xf32> to vector<8xf32>
    %107 = vector.shape_cast %106 : vector<8xf32> to vector<8x1xf32>
    %108 = tpu.reciprocal %107 {approx = true} : vector<8x1xf32> -> vector<8x1xf32>
    %109 = vector.broadcast %108 : vector<8x1xf32> to vector<8x16xf32>
    %110 = arith.mulf %105, %109 : vector<8x16xf32>
    %cst_58 = arith.constant dense<0.000000e+00> : vector<8x8xf32>
    %111 = tpu.matmul %110, %98, %cst_58 {dimension_numbers = #tpu.dot_dimension_numbers<[1], [0], [0], [1], [0, 0, 1, 1], [], []>} : vector<8x16xf32>, vector<16x8xf32>, vector<8x8xf32> -> vector<8x8xf32>
    %c0_59 = arith.constant 0 : index
    %c24 = arith.constant 24 : index
    %112 = vector.load %arg16[%c0_59, %c24] : memref<8x32xf32, #tpu.memory_space<vmem>>, vector<8x8xf32>
    tpu.vector_store %arg16[%c0_59, %c24], %111 {strides = array<i32>} : memref<8x32xf32, #tpu.memory_space<vmem>>, vector<8x8xf32>,
    %c0_60 = arith.constant 0 : index
    %c3 = arith.constant 3 : index
    %c0_61 = arith.constant 0 : index
    %c0_62 = arith.constant 0 : index
    %113 = vector.load %arg15[%c0_60, %c3, %c0_61, %c0_62] : memref<1x4x8x16xf32, #tpu.memory_space<vmem>>, vector<1x1x8x16xf32>
    %114 = vector.shape_cast %113 : vector<1x1x8x16xf32> to vector<8x16xf32>
    %115 = vector.shape_cast %110 : vector<8x16xf32> to vector<1x1x8x16xf32>
    tpu.vector_store %arg15[%c0_60, %c3, %c0_61, %c0_62], %115 {strides = array<i32>} : memref<1x4x8x16xf32, #tpu.memory_space<vmem>>, vector<1x1x8x16xf32>,
    %c0_63 = arith.constant 0 : index
    %c0_64 = arith.constant 0 : index
    %116 = vector.load %arg16[%c0_63, %c0_64] : memref<8x32xf32, #tpu.memory_space<vmem>>, vector<8x32xf32>
    %c0_65 = arith.constant 0 : index
    %c0_66 = arith.constant 0 : index
    %117 = vector.load %arg12[%c0_65, %c0_66] : memref<32x32xf32, #tpu.memory_space<vmem>>, vector<32x32xf32>
    %cst_67 = arith.constant dense<0.000000e+00> : vector<8x32xf32>
    %118 = tpu.matmul %116, %117, %cst_67 {dimension_numbers = #tpu.dot_dimension_numbers<[1], [0], [0], [1], [0, 0, 1, 1], [], []>} : vector<8x32xf32>, vector<32x32xf32>, vector<8x32xf32> -> vector<8x32xf32>
    %c0_68 = arith.constant 0 : index
    %c0_69 = arith.constant 0 : index
    %119 = vector.load %arg13[%c0_68, %c0_69] : memref<1x32xf32, #tpu.memory_space<vmem>>, vector<1x32xf32>
    %120 = vector.shape_cast %119 : vector<1x32xf32> to vector<32xf32>
    %121 = vector.shape_cast %120 : vector<32xf32> to vector<1x32xf32>
    %122 = vector.broadcast %121 : vector<1x32xf32> to vector<8x32xf32>
    %123 = arith.addf %118, %122 : vector<8x32xf32>
    %c0_70 = arith.constant 0 : index
    %c0_71 = arith.constant 0 : index
    %c0_72 = arith.constant 0 : index
    %124 = vector.load %arg14[%c0_70, %c0_71, %c0_72] : memref<1x8x32xf32, #tpu.memory_space<vmem>>, vector<1x8x32xf32>
    %125 = vector.shape_cast %124 : vector<1x8x32xf32> to vector<8x32xf32>
    %126 = vector.shape_cast %123 : vector<8x32xf32> to vector<1x8x32xf32>
    tpu.vector_store %arg14[%c0_70, %c0_71, %c0_72], %126 {strides = array<i32>} : memref<1x8x32xf32, #tpu.memory_space<vmem>>, vector<1x8x32xf32>,
    return
  }
  func.func @transform_0(%arg0: i32, %arg1: i32) -> (i32, i32, i32) {
    %c0_i32 = arith.constant 0 : i32
    %c0_i32_0 = arith.constant 0 : i32
    return %arg0, %arg1, %c0_i32 : i32, i32, i32
  }
  func.func @transform_1(%arg0: i32, %arg1: i32) -> (i32, i32, i32) {
    %c0_i32 = arith.constant 0 : i32
    %c0_i32_0 = arith.constant 0 : i32
    %c0_i32_1 = arith.constant 0 : i32
    return %arg0, %c0_i32, %c0_i32_0 : i32, i32, i32
  }
  func.func @transform_2(%arg0: i32, %arg1: i32) -> (i32, i32, i32) {
    %c0_i32 = arith.constant 0 : i32
    %c0_i32_0 = arith.constant 0 : i32
    %c0_i32_1 = arith.constant 0 : i32
    return %arg0, %c0_i32, %c0_i32_0 : i32, i32, i32
  }
  func.func @transform_3(%arg0: i32, %arg1: i32) -> (i32, i32, i32) {
    %c0_i32 = arith.constant 0 : i32
    %c0_i32_0 = arith.constant 0 : i32
    return %arg0, %arg1, %c0_i32 : i32, i32, i32
  }
  func.func @transform_4(%arg0: i32, %arg1: i32) -> (i32, i32) {
    %c0_i32 = arith.constant 0 : i32
    %c0_i32_0 = arith.constant 0 : i32
    %c0_i32_1 = arith.constant 0 : i32
    return %c0_i32, %c0_i32_0 : i32, i32
  }
  func.func @transform_5(%arg0: i32, %arg1: i32) -> (i32, i32) {
    %c0_i32 = arith.constant 0 : i32
    %c0_i32_0 = arith.constant 0 : i32
    %c0_i32_1 = arith.constant 0 : i32
    return %c0_i32, %c0_i32_0 : i32, i32
  }
  func.func @transform_6(%arg0: i32, %arg1: i32) -> (i32, i32) {
    %c0_i32 = arith.constant 0 : i32
    %c0_i32_0 = arith.constant 0 : i32
    %c0_i32_1 = arith.constant 0 : i32
    return %c0_i32, %c0_i32_0 : i32, i32
  }
  func.func @transform_7(%arg0: i32, %arg1: i32) -> (i32, i32) {
    %c0_i32 = arith.constant 0 : i32
    %c0_i32_0 = arith.constant 0 : i32
    %c0_i32_1 = arith.constant 0 : i32
    return %c0_i32, %c0_i32_0 : i32, i32
  }
  func.func @transform_8(%arg0: i32, %arg1: i32) -> (i32, i32) {
    %c0_i32 = arith.constant 0 : i32
    %c0_i32_0 = arith.constant 0 : i32
    %c0_i32_1 = arith.constant 0 : i32
    return %c0_i32, %c0_i32_0 : i32, i32
  }
  func.func @transform_9(%arg0: i32, %arg1: i32) -> (i32, i32) {
    %c0_i32 = arith.constant 0 : i32
    %c0_i32_0 = arith.constant 0 : i32
    %c0_i32_1 = arith.constant 0 : i32
    return %c0_i32, %c0_i32_0 : i32, i32
  }
  func.func @transform_10(%arg0: i32, %arg1: i32) -> (i32, i32) {
    %c0_i32 = arith.constant 0 : i32
    %c0_i32_0 = arith.constant 0 : i32
    %c0_i32_1 = arith.constant 0 : i32
    return %c0_i32, %c0_i32_0 : i32, i32
  }
  func.func @transform_11(%arg0: i32, %arg1: i32) -> (i32, i32) {
    %c0_i32 = arith.constant 0 : i32
    %c0_i32_0 = arith.constant 0 : i32
    %c0_i32_1 = arith.constant 0 : i32
    return %c0_i32, %c0_i32_0 : i32, i32
  }
  func.func @transform_12(%arg0: i32, %arg1: i32) -> (i32, i32, i32) {
    %c0_i32 = arith.constant 0 : i32
    %c0_i32_0 = arith.constant 0 : i32
    return %arg0, %arg1, %c0_i32 : i32, i32, i32
  }
  func.func @transform_13(%arg0: i32, %arg1: i32) -> (i32, i32, i32, i32) {
    %c0_i32 = arith.constant 0 : i32
    %c0_i32_0 = arith.constant 0 : i32
    %c0_i32_1 = arith.constant 0 : i32
    return %arg0, %c0_i32, %arg1, %c0_i32_0 : i32, i32, i32, i32
  }
}

</mosaic_0001>

<bundles_post_ra>
// kernel: tpu_custom_call.1
= control target key start
LH: loop header
LB: loop body
LE: loop exit
PB: predicated region body
PF: predicated region fallthrough
CT: control target
= control target key end

     0   :  { %s2592_s0 = inlined_call_operand.hbm [shape: f32[2,16,32], index: 0, kind: input, shape index: {}]   ;;  %s2593_s1 = inlined_call_operand.hbm [shape: f32[2,16,32], index: 1, kind: input, shape index: {}]   ;;  %s2594_s2 = inlined_call_operand.hbm [shape: f32[2,16,32], index: 2, kind: input, shape index: {}]   ;;  %s2595_s3 = inlined_call_operand.hbm [shape: f32[2,16,16], index: 3, kind: input, shape index: {}]   ;;  %s2596_s4 = inlined_call_operand.hbm [shape: f32[32,32], index: 4, kind: input, shape index: {}]   ;;  %s2597_s5 = inlined_call_operand.vmem [shape: f32[1,32], index: 5, kind: input, shape index: {}]   ;;  %s2598_s6 = inlined_call_operand.hbm [shape: f32[32,32], index: 6, kind: input, shape index: {}]   ;;  %s2599_s7 = inlined_call_operand.vmem [shape: f32[1,32], index: 7, kind: input, shape index: {}]   ;;  %s2600_s8 = inlined_call_operand.hbm [shape: f32[32,32], index: 8, kind: input, shape index: {}]   ;;  %s2601_s9 = inlined_call_operand.vmem [shape: f32[1,32], index: 9, kind: input, shape index: {}]   ;;  %s2602_s10 = inlined_call_operand.hbm [shape: f32[32,32], index: 10, kind: input, shape index: {}]   ;;  %s2603_s11 = inlined_call_operand.vmem [shape: f32[1,32], index: 11, kind: input, shape index: {}]   ;;  %s2604_s12 = inlined_call_operand.hbm [shape: f32[2,16,32], index: 12, kind: output, shape index: {0}]   ;;  %s2605_s13 = inlined_call_operand.hbm [shape: f32[2,4,16,16], index: 13, kind: output, shape index: {1}]  }
   0x1   :  { %2627 = sst [smem:[#allocation41_spill]] %s2592_s0 }
   0x2   :  { %2628 = sst [smem:[#allocation42_spill]] %s2593_s1 }
   0x3   :  { %2629 = sst [smem:[#allocation43_spill]] %s2594_s2 }
   0x4   :  { %2630 = sst [smem:[#allocation44_spill]] %s2595_s3 }
   0x5   :  { %2631 = sst [smem:[#allocation45_spill]] %s2596_s4 }
   0x6   :  { %2632 = sst [smem:[#allocation46_spill]] %s2597_s5 }
   0x7   :  { %2633 = sst [smem:[#allocation47_spill]] %s2598_s6 }
   0x8   :  { %2634 = sst [smem:[#allocation48_spill]] %s2599_s7 }
   0x9   :  { %2635 = sst [smem:[#allocation49_spill]] %s2600_s8 }
   0xa   :  { %2636 = sst [smem:[#allocation50_spill]] %s2601_s9 }
   0xb   :  { %2637 = sst [smem:[#allocation51_spill]] %s2602_s10 }
   0xc   :  { %2638 = sst [smem:[#allocation52_spill]] %s2603_s11 }
   0xd   :  { %2639 = sst [smem:[#allocation53_spill]] %s2604_s12 }
   0xe   :  { %2640 = sst [smem:[#allocation54_spill]] %s2605_s13 }
   0xf   :  { %19 = vsyncpa [#allocation4], 0 }
  0x10   :  { %21 = vsyncpa [#allocation4 + $0x1], 0 }
  0x11   :  { %22 = vsyncpa [#allocation7], 0 }
  0x12   :  { %24 = vsyncpa [#allocation7 + $0x1], 0 }
  0x13   :  { %25 = vsyncpa [#allocation10], 0 }
  0x14   :  { %27 = vsyncpa [#allocation10 + $0x1], 0 }
  0x15   :  { %28 = vsyncpa [#allocation13], 0 }
  0x16   :  { %29 = vsyncpa [#allocation16], 0 }
  0x17   :  { %30 = vsyncpa [#allocation5], 0 }
  0x18   :  { %32 = vsyncpa [#allocation5 + $0x1], 0 }
  0x19   :  { %33 = vsyncpa [#allocation19], 0 }
  0x1a   :  { %35 = vsyncpa [#allocation19 + $0x1], 0  ;;  %s2179_s25 = smov 0   ;;  %s2181_s26 = smov 0  }
  0x1b   :  { %s2183_s27 = smov 0   ;;  %s2185_s28 = smov 0  }
  0x1c   :  { %s2187_s29 = smov 0   ;;  %s2189_s30 = smov 0  }
  0x1d   :  { %s2191_s14 = smov 0   ;;  %s2193_s15 = smov 0  }
  0x1e   :  { %s2195_s16 = smov 0   ;;  %s2197_s17 = smov 0  }
  0x1f   :  { %s2199_s18 = smov 0  }
  0x20 LB: > { %2641 = sst [smem:[#allocation28_spill]] %s2056_s26  ;;  %s2235_s19 = sadd.s32 4294967295, %s2092_s18   ;;  %s2092_s18 = sphi %s2199_s18, %s41_s18   ;;  %s2088_s17 = sphi %s2197_s17, %s2706_s17   ;;  %s2084_s16 = sphi %s2195_s16, %s2705_s16   ;;  %s2080_s15 = sphi %s2193_s15, %s2704_s15   ;;  %s2076_s14 = sphi %s2191_s14, %s2703_s14   ;;  %s2072_s30 = sphi %s2189_s30, %s2702_s30   ;;  %s2068_s29 = sphi %s2187_s29, %s2701_s29   ;;  %s2064_s28 = sphi %s2185_s28, %s2700_s28   ;;  %s2060_s27 = sphi %s2183_s27, %s2699_s27   ;;  %s2056_s26 = sphi %s2181_s26, %s2698_s26   ;;  %s2052_s25 = sphi %s2179_s25, %s2693_s25  }
  0x21   : > { %2642 = sst [smem:[#allocation29_spill]] %s2064_s28  ;;  %p1405_p0 = scmp.ge.s32.totalorder %s2092_s18, 1 }
  0x22   : > { %2643 = sst [smem:[#allocation30_spill]] %s2076_s14  ;;  %p76_p1 = scmp.eq.s32.totalorder %s2235_s19, 0 }
  0x23   : > { %2644 = sst [smem:[#allocation31_spill]] %s2080_s15  ;;  %p390_p2 = scmp.lt.s32.totalorder %s2092_s18, 5 }
  0x24   : > { %2645 = sst [smem:[#allocation32_spill]] %s2235_s19  ;;  %s2094_s24 = smov [#allocation11]  }
  0x25   : > { %s2646_s4 = sld [smem:[#allocation45_spill]]  ;;  %p2243_p3 = pnand %p1405_p0, %p390_p2 }
  0x26   : > { %s403_s11 = sshll.u32 %s2094_s24, 4  ;;  %s2649_s6 = sld [smem:[#allocation47_spill]]  ;;  %s404_s11 = int_to_ptr.vmem [resolvable:$true] %s403_s11 }
  0x27   : > { %p1497_p4 = pneg %p2243_p3  ;;  %s2610_s13 = smov 128  }
  0x28   : > { %s2612_s24 = smov 8   ;;  %s2097_s14 = smov [#allocation12]  }
  0x29   : > { %p2251_p5 = pnand %p1497_p4, %p76_p1  ;;  %s420_s15 = sshll.u32 %s2097_s14, 4  ;;  %s421_s15 = int_to_ptr.vmem [resolvable:$true] %s420_s15 }
  0x2a   : > { %p70_p6 = scmp.eq.s32.totalorder %s2092_s18, 0  ;;  %p95_p7 = scmp.ne.s32.totalorder %s2060_s27, %s2056_s26 }
  0x2b   : > { %s401_s22 = sshll.u32 %s2646_s4, 4  ;;  %p101_p8 = scmp.ne.s32.totalorder %s2056_s26, %s2052_s25  ;;  %s402_s22 = int_to_ptr.hbm [resolvable:$true] %s401_s22 }
  0x2c   : > { %s418_s12 = sshll.u32 %s2649_s6, 4  ;;  %p2616_p9 = scmp.lt.s32.totalorder %s2092_s18, 4  ;;  %s419_s12 = int_to_ptr.hbm [resolvable:$true] %s418_s12 }
  0x2d   : > { %1500 = dma.hbm_to_vmem [thread:$0]  (!%p2251_p5), %s402_s22, 512, %s404_s11, [#allocation10], %s2610_s13, %s2610_s13, %s2612_s24  }
  0x2e   : > { %1503 = dma.hbm_to_vmem [thread:$0]  (!%p2251_p5), %s419_s12, 512, %s421_s15, [#allocation13], %s2610_s13, %s2610_s13, %s2612_s24  }
  0x2f   : > { %p97_p10 = por %p95_p7, %p70_p6  ;;  %p2280_p11 = por %p101_p8, %p76_p1 }
  0x30   : > { %s494_s14 = sand.u32 1, %s2060_s27   ;;  %s1467_s6 = sshll.u32 %s2088_s17, 4 }
  0x31   : > { %s2650_s11 = scalar_select %p2280_p11, 1, 0 }
  0x32   : > { %s1414_s22 = sshll.u32 %s494_s14, 4  ;;  %s2652_s1 = sld [smem:[#allocation42_spill]] }
  0x33   : > { %2651 = sst [smem:[#allocation33_spill]] %s2650_s11  ;;  %s496_s13 = scalar_lea.vmem [#allocation6], %s1414_s22 }
  0x34   : > { %s504_s25 = sshll.u32 %s496_s13, 4  ;;  %p2291_p12 = pnand %p2616_p9, %p97_p10  ;;  %s505_s25 = int_to_ptr.vmem [resolvable:$true] %s504_s25 }
  0x35   : > { %s2654_s2 = sld [smem:[#allocation43_spill]]  ;;  %s518_s5 = scalar_lea.vmem [#allocation8], %s1414_s22 }
  0x36   : > { %s2298_s11 = sshll.u32 %s518_s5, 4  ;;  %s2656_s12 = sand.u32 1, %s2092_s18  }
  0x37   : > { %2655 = sst [smem:[#allocation34_spill]] %s2298_s11  ;;  %s2302_s13 = scalar_lea.sflag [#allocation7], %s2656_s12 }
  0x38   : > { %s501_s15 = scalar_lea.hbm %s2652_s1, %s1467_s6  ;;  %s2658_s1 = smov 128  }
  0x39   : > { %s502_s4 = sshll.u32 %s501_s15, 4  ;;  %s2657_s15 = smov 8   ;;  %s503_s4 = int_to_ptr.hbm [resolvable:$true] %s502_s4 }
  0x3a   : > { %1516 = dma.hbm_to_vmem [thread:$0]  (!%p2291_p12), %s503_s4, 256, %s505_s25, %s2302_s13, %s2658_s1, %s2658_s1, %s2657_s15  }
  0x3b   : > { %s523_s14 = scalar_lea.hbm %s2654_s2, %s1467_s6  ;;  %s2659_s8 = sld [smem:[#allocation49_spill]] }
  0x3c   : > { %s524_s9 = sshll.u32 %s523_s14, 4  ;;  %s2098_s21 = smov [#allocation14]   ;;  %s2310_s9 = int_to_ptr.hbm [resolvable:$true] %s524_s9 }
  0x3d   : > { %s437_s22 = sshll.u32 %s2098_s21, 4  ;;  %s2660_s10 = sld [smem:[#allocation51_spill]]  ;;  %s438_s22 = int_to_ptr.vmem [resolvable:$true] %s437_s22 }
  0x3e   : > { %s2099_s25 = smov [#allocation15]   ;;  %s1404_s5 = sadd.s32 4294967294, %s2092_s18  }
  0x3f   : > { %s454_s6 = sshll.u32 %s2099_s25, 4  ;;  %s50_s21 = sadd.s32 1, %s2084_s16  ;;  %s455_s6 = int_to_ptr.vmem [resolvable:$true] %s454_s6 }
  0x40   : > { %p51_p13 = scmp.ge.s32.totalorder %s50_s21, 2  ;;  %s53_s14 = sadd.s32 1, %s2088_s17 }
  0x41   : > { %s435_s7 = sshll.u32 %s2659_s8, 4  ;;  %s62_s12 = sadd.s32 1, %s2072_s30  ;;  %s436_s7 = int_to_ptr.hbm [resolvable:$true] %s435_s7 }
  0x42   : > { %1506 = dma.hbm_to_vmem [thread:$0]  (!%p2251_p5), %s436_s7, 512, %s438_s22, [#allocation13], %s2658_s1, %s2658_s1, %s2657_s15  }
  0x43   : > { %s452_s4 = sshll.u32 %s2660_s10, 4  ;;  %p69_p0 = scmp.ne.s32.totalorder %s2072_s30, %s2068_s29  ;;  %s453_s4 = int_to_ptr.hbm [resolvable:$true] %s452_s4 }
  0x44   : > { %1509 = dma.hbm_to_vmem [thread:$0]  (!%p2251_p5), %s453_s4, 512, %s455_s6, [#allocation16], %s2658_s1, %s2658_s1, %s2657_s15  }
  0x45   : > { %s2708_s21 = smov (%p51_p13, %s50_s21), 0  ;;  %s2710_s14 = smov (!%p51_p13, %s53_s14), %s2088_s17 }
  0x46   : > { %2661 = sst [smem:[#allocation35_spill]] %s2708_s21  ;;  %s58_s20 = ssub.s32 %s2084_s16, %s2708_s21 }
  0x47   : > { %p2342_p2 = por %p70_p6, %p69_p0  ;;  %p55_p4 = scmp.ge.s32.totalorder %s2710_s14, 2 }
  0x48   : > { %p75_p5 = scmp.ne.s32.totalorder %s2068_s29, %s2064_s28  ;;  %p349_p7 = scmp.eq.s32.totalorder %s2235_s19, 3 }
  0x49   : > { %p355_p8 = scmp.eq.s32.totalorder %s1404_s5, 3  ;;  %s2712_s14 = smov (%p55_p4, %s2710_s14), 0 }
  0x4a   : > { %2663 = sst [smem:[#allocation36_spill]] %s2712_s14  ;;  %p2353_p10 = por %p76_p1, %p75_p5 }
  0x4b   : > { %p2357_p13 = por %p349_p7, %p69_p0  ;;  %s57_s25 = ssub.s32 %s2088_s17, %s2712_s14 }
  0x4c   : > { %p2363_p6 = por %p355_p8, %p75_p5  ;;  %s59_s5 = sor.u32 %s58_s20, %s57_s25 }
  0x4d   : > { %s2665_s4 = scalar_select %p2357_p13, 1, 0 }
  0x4e   : > { %s2667_s6 = scalar_select %p2363_p6, 1, 0 }
  0x4f   : > { %2666 = sst [smem:[#allocation37_spill]] %s2665_s4  ;;  %p86_p4 = scmp.eq.s32.totalorder %s57_s25, 0 }
  0x50   : > { %2668 = sst [smem:[#allocation38_spill]] %s2667_s6  ;;  %p60_p9 = scmp.eq.s32.totalorder %s59_s5, 0 }
  0x51   : > { %s471_s11 = sand.u32 1, %s2072_s30   ;;  %s2669_s2 = sadd.s32 1, %s2060_s27 }
  0x52   : > { %s2371_s8 = scalar_select %p86_p4, %s2060_s27, %s2669_s2  }
  0x53   : > { %s2671_s10 = sld [smem:[#allocation34_spill]]  ;;  %s1411_s14 = sshll.u32 %s471_s11, 3 }
  0x54   : > { %2670 = sst [smem:[#allocation39_spill]] %s2371_s8  ;;  %s1412_s28 = sshll.u32 %s2088_s17, 1 }
  0x55   : > { %s2374_s21 = scalar_select %p60_p9, %s2072_s30, %s62_s12  }
  0x56   : > { %s479_s4 = sadd.s32 %s2084_s16, %s1412_s28  ;;  %s475_s26 = scalar_lea.vmem [#allocation3], %s1411_s14 }
  0x57   : > { %2672 = sst [smem:[#allocation40_spill]] %s2374_s21  ;;  %s485_s19 = sshll.u32 %s475_s26, 4  ;;  %s486_s19 = int_to_ptr.vmem [resolvable:$true] %s485_s19 }
  0x58   : > { %s1413_s6 = sshll.u32 %s479_s4, 3  ;;  %s2673_s0 = sld [smem:[#allocation41_spill]] }
  0x59   : > { %p2674_p0 = scmp.lt.s32.totalorder %s2092_s18, 4  ;;  %s472_s8 = scalar_lea.sflag [#allocation4], %s471_s11 }
  0x5a   : > { %s2675_s3 = sld [smem:[#allocation44_spill]]  ;;  %s2676_s26 = int_to_ptr.vmem [resolvable:$true] %s2671_s10 }
  0x5b   : > { %p1511_p5 = pnand %p2674_p0, %p2342_p2  ;;  %s540_s20 = scalar_lea.vmem [#allocation9], %s1411_s14 }
  0x5c   : > { %1519 = dma.hbm_to_vmem [thread:$0]  (!%p2291_p12), %s2310_s9, 256, %s2676_s26, %s2302_s13, %s2658_s1, %s2658_s1, %s2657_s15  }
  0x5d   : > { %s550_s25 = sshll.u32 %s540_s20, 4  ;;  %s2677_s7 = sand.u32 1, %s2092_s18   ;;  %s551_s25 = int_to_ptr.vmem [resolvable:$true] %s550_s25 }
  0x5e   : > { %s481_s5 = scalar_lea.hbm %s2673_s0, %s1413_s6 }
  0x5f   : > { %s483_s2 = sshll.u32 %s481_s5, 4  ;;  %s537_s5 = scalar_lea.sflag [#allocation10], %s2677_s7  ;;  %s484_s2 = int_to_ptr.hbm [resolvable:$true] %s483_s2 }
  0x60   : > { %1513 = dma.hbm_to_vmem [thread:$0]  (!%p1511_p5), %s484_s2, 128, %s486_s19, %s472_s8  }
  0x61   : > { %s546_s28 = scalar_lea.hbm %s2675_s3, %s1413_s6  ;;  %559 = sbr.rel (%p2243_p3) target bundleno = 1189 (0x4a5), region = 68 }
  0x62   : > { %s548_s4 = sshll.u32 %s546_s28, 4  ;;  %s2402_s8 = sand.u32 (!%p2243_p3), 1, %s2068_s29   ;;  %s549_s4 = int_to_ptr.hbm [resolvable:$true] %s548_s4 }
  0x63   : > { %1522 = dma.hbm_to_vmem [thread:$0]  (!%p1511_p5), %s549_s4, 128, %s551_s25, %s537_s5  }
  0x64   : > { %s2405_s19 = sshll.u32 (!%p2243_p3), %s2402_s8, 3  ;;  %s562_s1 = scalar_lea.sflag (!%p2243_p3), [#allocation4], %s2402_s8 }
  0x65   : > { %s565_s10 = scalar_lea.vmem (!%p2243_p3), [#allocation3], %s2405_s19 }
  0x66   : > { %2019 = dma.done.wait (%p2353_p10), %s562_s1, 128  }
  0x67   : > { %2021 = vsyncadd (%p2353_p10), %s562_s1, 4294967168  ;;  %s2678_s24 = sld [smem:[#allocation32_spill]] }
  0x68   : > { %s2679_s11 = sld [smem:[#allocation28_spill]] }
  0x6d   : > { %s571_s9 = sand.u32 1, %s2678_s24  }
  0x6e   : > { %s573_s13 = sand.u32 1, %s2679_s11   ;;  %s572_s21 = scalar_lea.sflag [#allocation7], %s571_s9 }
  0x6f   : > { %s2415_s15 = sshll.u32 %s573_s13, 4 }
  0x70   : > { %s575_s14 = scalar_lea.vmem [#allocation6], %s2415_s15 }
  0x71   : > { %2023 = dma.done.wait (%p2280_p11), %s572_s21, 512  }
  0x72   : > { %2025 = vsyncadd (%p2280_p11), %s572_s21, 4294966784  ;;  %s585_s6 = scalar_lea.vmem [#allocation8], %s2415_s15  ;;  %s592_s2 = scalar_lea.sflag [#allocation10], %s571_s9 }
  0x73   : > { %s595_s12 = scalar_lea.vmem [#allocation9], %s2405_s19 }
  0x74   : > { %2027 = dma.done.wait (%p2353_p10), %s592_s2, 128  }
  0x75   : > { %2029 = vsyncadd (%p2353_p10), %s592_s2, 4294967168 }
  0x76   : > { %2031 = dma.done.wait (%p76_p1), [#allocation10], 512  }
  0x77   : > { %2033 = vsyncadd (%p76_p1), [#allocation10], 4294966784 }
  0x78   : > { %2035 = dma.done.wait (%p76_p1), [#allocation13], 1024  }
  0x79   : > { %2037 = vsyncadd (%p76_p1), [#allocation13], 4294966272 }
  0x7a   : > { %2039 = dma.done.wait (%p76_p1), [#allocation16], 512  }
  0x7b   : > { %2041 = vsyncadd (%p76_p1), [#allocation16], 4294966784  ;;  %v687_v0 = vld [vmem:[#allocation11 + $0x18] sm:$0xff]  ;;  %v686_v2 = vld [vmem:[#allocation11 + $0x10] sm:$0xff]  ;;  %vm692_vm0 = vcmask 261120   ;;  %s2681_s26 = sld [smem:[#allocation46_spill]] }
  0x7c   : > { %v719_v1 = vld [vmem:[#allocation12 + $0x18] sm:$0xff]  ;;  %708 = vmatpush.msra.mxu0 %v687_v0  ;;  %v718_v3 = vld [vmem:[#allocation12 + $0x10] sm:$0xff]  ;;  %v685_v4 = vld [vmem:[#allocation11 + $0x8] sm:$0xff]  ;;  %s2682_s25 = sld [smem:[#allocation48_spill]]  ;;  %s2100_s7 = smov 112   ;;  %vm794_vm1 = vcmask 64512  }
  0x7d   : > { %742 = vmatpush.msra.mxu1 %v719_v1  ;;  %v717_v5 = vld [vmem:[#allocation12 + $0x8] sm:$0xff]  ;;  %v684_v6 = vld [vmem:[#allocation11] sm:$0xff]  ;;  %s2101_s5 = smov 120   ;;  %s2102_s1 = smov 104   ;;  %v756_v21 = vld [vmem:[#allocation14 + $0x18] sm:$0xff]  ;;  %v2103_v35 = vmov 0.0  }
  0x7e   : > { %709 = vmatpush.msra.mxu0 %v686_v2  ;;  %v716_v7 = vld [vmem:[#allocation12] sm:$0xff]  ;;  %v681_v10 = vld [vmem:[%s575_s14 + $0x8] sm:$0xff]  ;;  %v755_v22 = vld [vmem:[#allocation14 + $0x10] sm:$0xff]  ;;  %779 = vmatpush.msra.mxu2 %v756_v21  ;;  %vm824_vm3 = vcmask 130048   ;;  %s2683_s11 = sld [smem:[#allocation50_spill]]  ;;  %s1433_s23 = sshll.u32 %s2402_s8, 5 }
  0x7f   : > { %743 = vmatpush.msra.mxu1 %v718_v3  ;;  %v679_v8 = vld [vmem:[%s565_s10] sm:$0xff]  ;;  %v680_v9 = vld [vmem:[%s575_s14] sm:$0xff]  ;;  %s2497_s9 = scalar_lea.vmem [#allocation18], %s1433_s23  ;;  %s2104_s13 = smov 8   ;;  %vm939_vm4 = vcmask 130112   ;;  %vm1019_vm5 = vcmask 195712  }
  0x80   : > { %710 = vmatpush.msra.mxu0 %v685_v4  ;;  %v754_v23 = vld [vmem:[#allocation14 + $0x8] sm:$0xff]  ;;  %780 = vmatpush.msra.mxu2 %v755_v22  ;;  %v753_v26 = vld [vmem:[#allocation14] sm:$0xff]  ;;  %v791_v33 = vld [vmem:[%s595_s12] sm:$0xff]  ;;  %s2105_s15 = smov 24   ;;  %s2106_s21 = smov 16   ;;  %vm1099_vm6 = vcmask 261312  }
  0x81   : > { %744 = vmatpush.msra.mxu1 %v717_v5  ;;  %v1658_v11 = vld [vmem:[%s2681_s26] ss:$0 sm:$0xff]  ;;  %v682_v27 = vld [vmem:[%s585_s6] sm:$0xff]  ;;  %vm792_vm2 = vcmp.eq.f32.partialorder %v791_v33, 0.0  ;;  %s2684_s14 = sld [smem:[#allocation31_spill]]  ;;  %s1171_s28 = sshll.u32 %s2497_s9, 4  ;;  %s1172_s28 = int_to_ptr.vmem [resolvable:$true] %s1171_s28 }
  0x82   : > { %711 = vmatpush.msra.mxu0 %v684_v6  ;;  %v1659_v12 = vld [vmem:[%s2682_s25] ss:$0 sm:$0xff]  ;;  %781 = vmatpush.msra.mxu2 %v754_v23  ;;  %v793_v36 = vsel %vm792_vm2, -1e+30, %v2103_v35  ;;  %s2687_s25 = sld [smem:[#allocation54_spill]]  ;;  %s1142_s10 = scalar_lea.sflag [#allocation19], %s2402_s8 }
  0x83   : > { %745 = vmatpush.msra.mxu1 %v716_v7  ;;  %1434 = vmatmul.msk.f32.vlgmr.msra.gmra.mxu0 %vm692_vm0, %v679_v8  ;;  %v683_v40 = vld [vmem:[%s585_s6 + $0x8] sm:$0xff]  ;;  %s2685_s6 = sld [smem:[#allocation30_spill]] }
  0x84   : > { %1435 = vmatmul.msk.f32.vlgmr.msra.gmra.mxu1 %vm692_vm0, %v680_v9  ;;  %782 = vmatpush.msra.mxu2 %v753_v26  ;;  %v1660_v56 = vld [vmem:[%s2683_s11] ss:$0 sm:$0xff] }
  0x85   : > { %1437 = vmatmul.msk.f32.vlgmr.msra.gmra.mxu2 %vm692_vm0, %v682_v27 }
  0x87   : > { %s1463_s12 = sshll.u32 %s2684_s14, 3 }
  0x89   : > { %s1168_s22 = sadd.s32 %s2685_s6, %s1463_s12 }
  0x8a   : > { %s1464_s26 = sshll.u32 %s1168_s22, 3 }
  0x8c   : > { %1436 = vmatmul.msk.f32.gmra.mxu1 %vm692_vm0, %v681_v10 }
  0x8d   : > { %1438 = vmatmul.msk.f32.gmra.mxu2 %vm692_vm0, %v683_v40 }
 0x100   : > { %v713_v13 = vpop.f32.mrf.mxu0 }
 0x101   : > { %v747_v14 = vpop.f32.mrf.mxu1  ;;  %v714_v15 = vadd.f32 %v1658_v11, %v713_v13 }
 0x102   : > { %v748_v16 = vadd.f32 %v1659_v12, %v747_v14 }
 0x103   : > { %v790_v17 = vmul.f32 0.35355338, %v714_v15 }
 0x104   : > { %945 = vrot.lane.b32.xlu2 %v748_v16, %s2100_s7 }
 0x105   : > { %861 = vrot.lane.b32.xlu1 %v790_v17, %s2101_s5 }
 0x108   : > { %v784_v55 = vpop.f32.mrf.mxu2 }
 0x109   : > { %v750_v18 = vpop.f32.mrf.mxu1  ;;  %v785_v57 = vadd.f32 %v1660_v56, %v784_v55 }
 0x10a   : > { %v751_v19 = vadd.f32 %v1659_v12, %v750_v18 }
 0x10c   : > { %865 = vrot.lane.b32.xlu0 %v751_v19, %s2101_s5  ;;  %1439 = vmatpush.xpose.msk.msra.mxu3 %vm794_vm1, %v751_v19 }
 0x10d   : > { %1027 = vrot.lane.b32.xlu2 %v751_v19, %s2102_s1  ;;  %947 = vrot.lane.b32.xlu1 %v751_v19, %s2100_s7 }
 0x110   : > { %1440 = vmatpush.xpose.msk.msra.mxu3 %vm794_vm1, %v748_v16  ;;  %v787_v58 = vpop.f32.mrf.mxu2 }
 0x111   : > { %v788_v59 = vadd.f32 %v1660_v56, %v787_v58 }
 0x113   : > { %1441 = vmatmul.msk.f32.vlgmr.msra.gmra.mxu3 %vm794_vm1, %v790_v17  ;;  %853 = vmatpush.msrb.mxu0 %v788_v59  ;;  %v1643_v60 = vpack.i.bf16 %v785_v57, %v788_v59 }
 0x114   : > { %863 = vrot.lane.b32.xlu0 %v748_v16, %s2101_s5 }
 0x115   : > { %1023 = vrot.lane.b32.xlu2 %v790_v17, %s2102_s1  ;;  %943 = vrot.lane.b32.xlu1 %v790_v17, %s2100_s7 }
 0x116   : > { %854 = vmatpush.msrb.mxu0 %v785_v57 }
 0x11c   : > { %1025 = vrot.lane.b32.xlu0 %v748_v16, %s2102_s1 }
 0x15e   : > { %v946_v24 = vpop.permute.xlu2 %945 }
 0x167   : > { %v1028_v30 = vpop.permute.xlu2 %1027 }
 0x16f   : > { %v1024_v34 = vpop.permute.xlu2 %1023 }
 0x177   : > { %v862_v20 = vpop.permute.xlu1 %861 }
 0x17e   : > { %v866_v25 = vpop.permute.xlu0 %865 }
 0x17f   : > { %1443 = vmatpush.xpose.msk.msrb.mxu3 %vm794_vm1, %v866_v25  ;;  %v948_v28 = vpop.permute.xlu1 %947 }
 0x180   : > { %1448 = vmatpush.xpose.msk.msrb.mxu1 %vm794_vm1, %v948_v28 }
 0x184   : > { %1449 = vmatpush.xpose.msk.msrb.mxu1 %vm794_vm1, %v946_v24 }
 0x186   : > { %v864_v29 = vpop.permute.xlu0 %863 }
 0x187   : > { %1444 = vmatpush.xpose.msk.msrb.mxu3 %vm794_vm1, %v864_v29  ;;  %v944_v31 = vpop.permute.xlu1 %943 }
 0x188   : > { %1450 = vmatmul.msk.f32.vlgmr.msrb.gmra.mxu1 %vm794_vm1, %v944_v31 }
 0x18a   : > { %1445 = vmatmul.msk.f32.vlgmr.msrb.gmra.mxu3 %vm794_vm1, %v862_v20 }
 0x18b   : > { %1453 = vmatpush.xpose.msk.msra.mxu3 %vm794_vm1, %v1028_v30 }
 0x18e   : > { %v1026_v32 = vpop.permute.xlu0 %1025 }
 0x18f   : > { %1454 = vmatpush.xpose.msk.msra.mxu3 %vm794_vm1, %v1026_v32 }
 0x192   : > { %1455 = vmatmul.msk.f32.vlgmr.msra.gmra.mxu3 %vm794_vm1, %v1024_v34 }
 0x196   : > { %v821_v37 = vpop.f32.mrf.mxu3 }
 0x197   : > { %v822_v38 = vadd.f32 %v821_v37, %v793_v36  ;;  %v1107_v37 = vld [vmem:[#allocation15 + $0x18] sm:$0xff] }
 0x198   : > { %1127 = vmatpush.msra.mxu1 %v1107_v37 }
 0x199   : > { %v825_v39 = vsel %vm824_vm3, %v822_v38, -inf }
 0x19a   : > { %826 = vmax.xlane.f32.xlu0 %v825_v39  ;;  %v1105_v39 = vld [vmem:[#allocation15 + $0x8] sm:$0xff] }
 0x205   : > { %v972_v41 = vpop.f32.mrf.mxu1 }
 0x206   : > { %v973_v42 = vadd.f32 %v972_v41, %v793_v36  ;;  %v1104_v41 = vld [vmem:[#allocation15] sm:$0xff] }
 0x208   : > { %v975_v43 = vsel %vm824_vm3, %v973_v42, -inf }
 0x209   : > { %976 = vmax.xlane.f32.xlu2 %v975_v43 }
 0x20d   : > { %v890_v44 = vpop.f32.mrf.mxu3  ;;  %v827_v45 = vpop.xlane.xlu0 %826 }
 0x20e   : > { %v891_v46 = vadd.f32 %v890_v44, %v793_v36  ;;  %v828_v47 = vsub.f32 %v822_v38, %v827_v45  ;;  %v1106_v38 = vld [vmem:[#allocation15 + $0x10] sm:$0xff] }
 0x20f   : > { %1128 = vmatpush.msra.mxu1 %v1106_v38 }
 0x210   : > { %v829_v48 = vmul.f32 1.442695, %v828_v47  ;;  %v893_v49 = vsel %vm824_vm3, %v891_v46, -inf }
 0x211   : > { %894 = vmax.xlane.f32.xlu1 %v893_v49  ;;  %1129 = vmatpush.msra.mxu1 %v1105_v39 }
 0x212   : > { %1662 = vpow2.f32 %v829_v48 }
 0x213   : > { %1130 = vmatpush.msra.mxu1 %v1104_v41 }
 0x215   : > { %v1052_v50 = vpop.f32.mrf.mxu3 }
 0x216   : > { %v1053_v51 = vadd.f32 %v1052_v50, %v793_v36 }
 0x218   : > { %v1663_v52 = vpop.eup %1662  ;;  %v1055_v53 = vsel %vm824_vm3, %v1053_v51, -inf }
 0x219   : > { %1056 = vmax.xlane.f32.xlu2 %v1055_v53  ;;  %v831_v54 = vsel %vm824_vm3, %v1663_v52, 0.0 }
 0x21a   : > { %832 = vadd.xlane.f32.xlu0 %v831_v54 }
 0x22e   : > { %1644 = vrot.lane.b32.xlu0 %v1643_v60, %s2101_s5  ;;  %s1170_s5 = scalar_lea.hbm %s2687_s25, %s1464_s26 }
 0x27c   : > { %v977_v61 = vpop.xlane.xlu2 %976 }
 0x27d   : > { %v978_v62 = vsub.f32 %v973_v42, %v977_v61 }
 0x27f   : > { %v979_v63 = vmul.f32 1.442695, %v978_v62 }
 0x281   : > { %1664 = vpow2.f32 %v979_v63 }
 0x284   : > { %v895_v0 = vpop.xlane.xlu1 %894 }
 0x285   : > { %v896_v1 = vsub.f32 %v891_v46, %v895_v0 }
 0x287   : > { %v897_v2 = vmul.f32 1.442695, %v896_v1  ;;  %v1665_v3 = vpop.eup %1664 }
 0x288   : > { %v981_v4 = vsel %vm824_vm3, %v1665_v3, 0.0 }
 0x289   : > { %1666 = vpow2.f32 %v897_v2  ;;  %982 = vadd.xlane.f32.xlu2 %v981_v4 }
 0x28c   : > { %v1057_v5 = vpop.xlane.xlu2 %1056 }
 0x28d   : > { %v1058_v6 = vsub.f32 %v1053_v51, %v1057_v5  ;;  %v833_v7 = vpop.xlane.xlu0 %832 }
 0x28e   : > { %1668 = vrcp.f32 %v833_v7 }
 0x28f   : > { %v1667_v8 = vpop.eup %1666  ;;  %v1059_v9 = vmul.f32 1.442695, %v1058_v6 }
 0x290   : > { %v899_v10 = vsel %vm824_vm3, %v1667_v8, 0.0 }
 0x291   : > { %1670 = vpow2.f32 %v1059_v9  ;;  %900 = vadd.xlane.f32.xlu1 %v899_v10 }
 0x294   : > { %v1669_v11 = vpop.eup %1668 }
 0x295   : > { %v835_v12 = vmul.f32 %v1669_v11, %v1663_v52 }
 0x297   : > { %v1671_v13 = vpop.eup %1670  ;;  %1442 = vmatmul.msk.f32.vlgmr.msrb.gmra.mxu0 %vm824_vm3, %v835_v12  ;;  %860 = vst.msk [vmem:[%s2497_s9] sm:$0xff] %vm824_vm3, %v835_v12 }
 0x298   : > { %v1061_v14 = vsel %vm824_vm3, %v1671_v13, 0.0 }
 0x299   : > { %1062 = vadd.xlane.f32.xlu2 %v1061_v14 }
 0x2a0   : > { %v1645_v15 = vpop.permute.xlu0 %1644 }
 0x2a1   : > { %v1646_v16 = vunpack.i.l.bf16 %v1645_v15  ;;  %v1647_v17 = vunpack.i.h.bf16 %v1645_v15 }
 0x2a3   : > { %929 = vmatpush.msra.mxu0 %v1646_v16 }
 0x2a5   : > { %930 = vmatpush.msra.mxu0 %v1647_v17 }
 0x2aa   : > { %1649 = vrot.lane.b32.xlu1 %v1643_v60, %s2100_s7  ;;  %s2688_s7 = smov %s2687_s25 }
 0x2b1   : > { %1654 = vrot.lane.b32.xlu2 %v1643_v60, %s2102_s1  ;;  %s1173_s1 = sshll.u32 %s1170_s5, 4  ;;  %s1174_s1 = int_to_ptr.hbm [resolvable:$true] %s1173_s1 }
 0x2b2   : > { %s1932_s24 = sshra.s32 %s1174_s1, 4  ;;  %s1933_s24 = int_to_ptr.hbm [resolvable:$true] %s1932_s24 }
 0x2b3   : > { %s1934_s11 = scalar_lea.hbm %s1933_s24, 32  ;;  %p1939_p11 = scmp.lt.s32.totalorder %s1933_s24, %s2688_s7 }
 0x2b4   : > { %p1935_p1 = scmp.ne.s32.totalorder %s1933_s24, %s1934_s11 }
 0x2b6   : > { %p1936_p3 = pnand %p1935_p1, %p2357_p13 }
 0x2b8   : > { %p1937_p9 = pneg %p1936_p3 }
 0x2fc   : > { %v983_v18 = vpop.xlane.xlu2 %982 }
 0x2fd   : > { %1672 = vrcp.f32 %v983_v18 }
 0x303   : > { %v1673_v19 = vpop.eup %1672 }
 0x304   : > { %v901_v20 = vpop.xlane.xlu1 %900  ;;  %v985_v21 = vmul.f32 %v1673_v19, %v1665_v3 }
 0x305   : > { %1674 = vrcp.f32 %v901_v20 }
 0x306   : > { %1452 = vst.msk [vmem:[%s2497_s9 + $0x10] sm:$0xff] %vm824_vm3, %v985_v21 }
 0x30b   : > { %v1675_v22 = vpop.eup %1674 }
 0x30c   : > { %v903_v23 = vmul.f32 %v1675_v22, %v1667_v8  ;;  %v1063_v24 = vpop.xlane.xlu2 %1062 }
 0x30d   : > { %1676 = vrcp.f32 %v1063_v24 }
 0x30e   : > { %1447 = vst.msk [vmem:[%s2497_s9 + $0x8] sm:$0xff] %vm824_vm3, %v903_v23  ;;  %1446 = vmatmul.msk.f32.vlgmr.msra.gmra.mxu0 %vm824_vm3, %v903_v23 }
 0x313   : > { %v1677_v25 = vpop.eup %1676 }
 0x314   : > { %v1065_v26 = vmul.f32 %v1677_v25, %v1671_v13  ;;  %v1655_v27 = vpop.permute.xlu2 %1654  ;;  %v856_v28 = vpop.f32.mrf.mxu0 }
 0x315   : > { %v1656_v29 = vunpack.i.l.bf16 %v1655_v27  ;;  %859 = vst.msk [vmem:[#allocation2] sm:$0xff] %vm794_vm1, %v856_v28  ;;  %v1657_v30 = vunpack.i.h.bf16 %v1655_v27 }
 0x316   : > { %1457 = vst.msk [vmem:[%s2497_s9 + $0x18] sm:$0xff] %vm824_vm3, %v1065_v26 }
 0x317   : > { %1089 = vmatpush.msrb.mxu0 %v1656_v29 }
 0x319   : > { %1090 = vmatpush.msrb.mxu0 %v1657_v30 }
 0x31a   : > { %1456 = vmatmul.msk.f32.vlgmr.msrb.gmra.mxu0 %vm824_vm3, %v1065_v26 }
 0x31c   : > { %v1650_v31 = vpop.permute.xlu1 %1649 }
 0x31d   : > { %v1651_v32 = vunpack.i.l.bf16 %v1650_v31  ;;  %v1652_v33 = vunpack.i.h.bf16 %v1650_v31 }
 0x31f   : > { %1009 = vmatpush.msrb.mxu2 %v1651_v32 }
 0x321   : > { %1010 = vmatpush.msrb.mxu2 %v1652_v33 }
 0x322   : > { %1451 = vmatmul.msk.f32.vlgmr.msrb.gmra.mxu2 %vm824_vm3, %v985_v21 }
 0x38b   : > { %v932_v34 = vpop.f32.mrf.mxu0 }
 0x38c   : > { %936 = vrot.lane.b32.xlu0 %v932_v34, %s2104_s13 }
 0x397   : > { %v1092_v35 = vpop.f32.mrf.mxu0 }
 0x398   : > { %1096 = vrot.lane.b32.xlu0 %v1092_v35, %s2105_s15  ;;  %s1938_s15 = scalar_lea.hbm %s2688_s7, 128 }
 0x399   : > { %p1940_p12 = scmp.lt.s32.totalorder %s1938_s15, %s1934_s11 }
 0x39b   : > { %p1941_p2 = por %p1940_p12, %p1939_p11 }
 0x39d   : > { %p1942_p7 = pnand %p1941_p2, %p1937_p9 }
 0x3a5   : > { %v1012_v36 = vpop.f32.mrf.mxu2 }
 0x3a6   : > { %1016 = vrot.lane.b32.xlu1 %v1012_v36, %s2106_s21 }
 0x3fe   : > { %v937_v40 = vpop.permute.xlu0 %936 }
 0x3ff   : > { %940 = vst.msk [vmem:[#allocation2] sm:$0xff] %vm939_vm4, %v937_v40 }
 0x40a   : > { %v1097_v43 = vpop.permute.xlu0 %1096 }
 0x418   : > { %v1017_v42 = vpop.permute.xlu1 %1016 }
 0x419   : > { %1020 = vst.msk [vmem:[#allocation2] sm:$0xff] %vm1019_vm5, %v1017_v42 }
 0x41a   : > { %1100 = vst.msk [vmem:[#allocation2] sm:$0xff] %vm1099_vm6, %v1097_v43 }
 0x421   : > { %v1103_v44 = vld [vmem:[#allocation2] sm:$0xff] }
 0x422   : > { %1458 = vmatmul.msk.f32.vlgmr.msra.gmra.mxu1 %vm692_vm0, %v1103_v44 }
 0x423   : > { %1945 = shalt.err (!%p1942_p7)
}
 0x424   : > { %s2107_s22 = smov 128   ;;  %s2108_s26 = smov 256  }
 0x425   : > { %1494 = dma.vmem_to_hbm [thread:$0]  (%p2357_p13), %s1172_s28, 512, %s1174_s1, %s1142_s10, %s2107_s22, %s2108_s26, %s2104_s13  }
 0x426   : > { %s1461_s4 = sshll.u32 %s2684_s14, 1  ;;  %s2689_s24 = sld [smem:[#allocation53_spill]] }
 0x427   : > { %s1152_s20 = sadd.s32 %s2685_s6, %s1461_s4  ;;  %s2690_s21 = sld [smem:[#allocation52_spill]] }
 0x428   : > { %s1462_s25 = sshll.u32 %s1152_s20, 3  ;;  %s671_s12 = scalar_lea.vmem [#allocation17], %s2405_s19 }
 0x429   : > { %s1156_s0 = sshll.u32 %s671_s12, 4  ;;  %s1137_s13 = scalar_lea.sflag [#allocation5], %s2402_s8  ;;  %s1157_s0 = int_to_ptr.vmem [resolvable:$true] %s1156_s0 }
 0x42c   : > { %s1154_s11 = scalar_lea.hbm %s2689_s24, %s1462_s25  ;;  %s1966_s19 = scalar_lea.hbm %s2689_s24, 32 }
 0x42d   : > { %v1661_v45 = vld [vmem:[%s2690_s21] ss:$0 sm:$0xff]  ;;  %s1158_s3 = sshll.u32 %s1154_s11, 4  ;;  %s1159_s3 = int_to_ptr.hbm [resolvable:$true] %s1158_s3 }
 0x42e   : > { %s1960_s14 = sshra.s32 %s1159_s3, 4  ;;  %s1961_s14 = int_to_ptr.hbm [resolvable:$true] %s1960_s14 }
 0x42f   : > { %s1962_s6 = scalar_lea.hbm %s1961_s14, 8  ;;  %p1967_p0 = scmp.lt.s32.totalorder %s1961_s14, %s2689_s24 }
 0x430   : > { %p1963_p8 = scmp.ne.s32.totalorder %s1961_s14, %s1962_s6  ;;  %p1968_p5 = scmp.lt.s32.totalorder %s1966_s19, %s1962_s6 }
 0x432   : > { %p1964_p10 = pnand %p1963_p8, %p2357_p13  ;;  %p1969_p1 = por %p1968_p5, %p1967_p0 }
 0x434   : > { %p1965_p4 = pneg %p1964_p10 }
 0x436   : > { %p1970_p3 = pnand %p1969_p1, %p1965_p4 }
 0x49f   : > { %v1132_v46 = vpop.f32.mrf.mxu1 }
 0x4a0   : > { %v1133_v47 = vadd.f32 %v1661_v45, %v1132_v46 }
 0x4a2   : > { %1135 = vst.msk [vmem:[%s671_s12] sm:$0xff] %vm692_vm0, %v1133_v47 }
 0x4a3   : > { %1973 = shalt.err (!%p1970_p3)
}
 0x4a4   : > { %1493 = dma.vmem_to_hbm [thread:$0]  (%p2357_p13), %s1157_s0, 128, %s1159_s3, %s1137_s13  }
 0x4a5 PF: > { %s2691_s8 = sld [smem:[#allocation29_spill]]  ;;  %p1539_p9 = scmp.ge.s32.totalorder %s2092_s18, 2 }
 0x4a7   : > { %p1524_p11 = pnand %p1539_p9, %p2363_p6 }
 0x4a9   : > { %p1525_p12 = pneg %p1524_p11 }
 0x4ab   : > { %s1188_s4 = sand.u32 1, %s2691_s8  }
 0x4ac   : > { %s1189_s20 = scalar_lea.sflag [#allocation5], %s1188_s4 }
 0x4ad   : > { %2043 = dma.done.wait (%p1525_p12), %s1189_s20, 128  }
 0x4ae   : > { %2045 = vsyncadd (%p1525_p12), %s1189_s20, 4294967168  ;;  %s1199_s25 = scalar_lea.sflag [#allocation19], %s1188_s4 }
 0x4af   : > { %2047 = dma.done.wait (%p1525_p12), %s1199_s25, 512  }
 0x4b0   : > { %2049 = vsyncadd (%p1525_p12), %s1199_s25, 4294966784  ;;  %s41_s18 = sadd.s32 1, %s2092_s18   ;;  %s2693_s25 = sld [smem:[#allocation28_spill]] }
 0x4b1   : > { %p38_p2 = scmp.ge.s32.totalorder %s41_s18, 6   ;;  %s2694_s0 = sld [smem:[#allocation39_spill]] }
 0x4b2   : > { %s2695_s3 = sld [smem:[#allocation40_spill]]  ;;  %s2698_s26 = smov %s2060_s27 }
 0x4b3   : > { %s2696_s2 = sld [smem:[#allocation35_spill]]  ;;  %s2700_s28 = smov %s2068_s29 }
 0x4b4   : > { %s2697_s5 = sld [smem:[#allocation36_spill]]  ;;  %s2701_s29 = smov %s2072_s30 }
 0x4b5   : > { %s2703_s14 = smov %s2084_s16  ;;  %s2704_s15 = smov %s2088_s17 }
 0x4b6   :  { %40 = sbr.rel (!%p38_p2) target bundleno = 32 (0x20), region = 186 }
 0x4b7   : > { %s2699_s27 = smov %s2694_s0 }
 0x4b8   : > { %s2702_s30 = smov %s2695_s3 }
 0x4b9   : > { %s2705_s16 = smov %s2696_s2 }
 0x4ba   : > { %s2706_s17 = smov %s2697_s5 }
 0x4bb   :  { %1205 = vsyncpa [#allocation4], 1 }
 0x4bc   :  { %1207 = vsyncpa [#allocation4 + $0x1], 1 }
 0x4bd   :  { %1208 = vsyncpa [#allocation7], 1 }
 0x4be   :  { %1210 = vsyncpa [#allocation7 + $0x1], 1 }
 0x4bf   :  { %1211 = vsyncpa [#allocation10], 1 }
 0x4c0   :  { %1213 = vsyncpa [#allocation10 + $0x1], 1 }
 0x4c1   :  { %1214 = vsyncpa [#allocation13], 1 }
 0x4c2   :  { %1215 = vsyncpa [#allocation16], 1 }
 0x4c3   :  { %1216 = vsyncpa [#allocation5], 1 }
 0x4c4   :  { %1218 = vsyncpa [#allocation5 + $0x1], 1 }
 0x4c5   :  { %1219 = vsyncpa [#allocation19], 1 }
 0x4c6   :  { %1221 = vsyncpa [#allocation19 + $0x1], 1 }

</bundles_post_ra>
